<compile_context>
chip_gen: v6e
topology: v6e:2x2x1
jax: 0.10.0
libtpu: 0.0.40
codegen_flags: <defaults>
</compile_context>

<pallas_src>
import math

import jax
import jax.numpy as jnp
from jax import lax
from jax.experimental import pallas as pl
from jax.experimental.pallas import tpu as pltpu


def _make_wass_kernel(eps: float, max_iter: int, thresh: float):
    inv_eps = 1.0 / eps

    def kernel(x_ref, yt_ref, out_ref):
        x = x_ref[0]           # (N, D) float32  -- this batch element's predictions
        yt = yt_ref[0]         # (D, M) float32  -- this batch element's labels, transposed
        N = x.shape[0]
        M = yt.shape[-1]

        # ---- cost matrix on the MXU:  C_ij = ||x_i||^2 + ||y_j||^2 - 2 <x_i, y_j> ----
        x2 = jnp.sum(x * x, axis=-1, keepdims=True)                  # (N, 1)
        y2 = jnp.sum(yt * yt, axis=-2, keepdims=True)                # (1, M)
        xy = jnp.dot(x, yt, preferred_element_type=jnp.float32)      # (N, M)  MXU
        # K = -C / eps, computed once; C itself is never materialized / kept alive.
        K = (2.0 * xy - x2 - y2) * inv_eps                           # (N, M)

        log_mu = jnp.float32(math.log(1.0 / N + 1e-8))
        log_nu = jnp.float32(math.log(1.0 / M + 1e-8))

        def lse_rows(mat):     # stable logsumexp over last axis -> (N, 1)
            mx = jnp.max(mat, axis=-1, keepdims=True)
            return mx + jnp.log(jnp.sum(jnp.exp(mat - mx), axis=-1, keepdims=True))

        def lse_cols(mat):     # stable logsumexp over axis -2 -> (1, M)
            mx = jnp.max(mat, axis=-2, keepdims=True)
            return mx + jnp.log(jnp.sum(jnp.exp(mat - mx), axis=-2, keepdims=True))

        # Sinkhorn loop on eps-scaled potentials ue = u/eps, ve = v/eps, so the modified
        # cost is simply M_ij = K_ij + ue_i + ve_j (two adds per element per evaluation).
        # TODO(synk): PyTorch breaks on the batch-MEAN err (err.item() couples the batch);
        # with the batch tiled over the grid each element exits on its own err < thresh
        # (identical for B == 1 and at convergence).
        def cond(carry):
            it, _, _, err = carry
            return jnp.logical_and(it < max_iter, err >= thresh)

        def body(carry):
            it, ue, ve, _ = carry
            ue_new = (log_mu - lse_rows(K + ue + ve)) + ue            # (N, 1)
            ve_new = (log_nu - lse_cols(K + ue_new + ve)) + ve        # (1, M)
            # err = sum_i |u_new - u_old| = eps * sum_i |ue_new - ue|  (unscaled u)
            err = eps * jnp.sum(jnp.abs(ue_new - ue))
            return (it + 1, ue_new, ve_new, err)

        init = (jnp.int32(0),
                jnp.zeros((N, 1), jnp.float32),
                jnp.zeros((1, M), jnp.float32),
                jnp.float32(jnp.inf))
        _, ue, ve, _ = lax.while_loop(cond, body, init)

        # transport plan and per-batch cost:  sum(pi * C) = -eps * sum(pi * K)
        pi = jnp.exp(K + ue + ve)                                     # (N, M)
        cost_b = -eps * jnp.sum(pi * K)

        # lane-dense per-batch partial; reduced to mean/sum in the JAX wrapper.
        out_ref[...] = jnp.full(out_ref.shape, cost_b, jnp.float32)

    return kernel


def wass_dist_loss(output, labels, eps: float = 1e-3, max_iter: int = 100,
                   reduction: str = "mean"):
    """Pallas implementation of WassDistLoss.forward (batched 3-D inputs)."""
    output = jnp.asarray(output, jnp.float32)
    labels = jnp.asarray(labels, jnp.float32)
    # torch's output.squeeze(): handle the unbatched 2-D case explicitly.
    if output.ndim == 2:
        output = output[None]
    if labels.ndim == 2:
        labels = labels[None]
    B, N, D = output.shape
    _, M, _ = labels.shape
    labels_t = jnp.transpose(labels, (0, 2, 1))          # (B, D, M): MXU / lane friendly

    # TODO(synk): for very large N*M the per-batch (N, M) matrix should additionally be
    # row-tiled (and vmem_limit_bytes raised) to fit v7x's 64 MiB VMEM; unnecessary here.
    kernel = _make_wass_kernel(eps, max_iter, 0.1)
    partial = pl.pallas_call(
        kernel,
        out_shape=jax.ShapeDtypeStruct((B, 8, 128), jnp.float32),
        grid=(B,),
        in_specs=[
            pl.BlockSpec((1, N, D), lambda b: (b, 0, 0)),
            pl.BlockSpec((1, D, M), lambda b: (b, 0, 0)),
        ],
        out_specs=pl.BlockSpec((1, 8, 128), lambda b: (b, 0, 0)),
        compiler_params=pltpu.CompilerParams(
            dimension_semantics=("parallel",)),
    )(output, labels_t)

    per_batch = partial[:, 0, 0]                          # (B,) per-batch Sinkhorn costs
    return jnp.mean(per_batch) if reduction == "mean" else jnp.sum(per_batch)


def wass_dist_loss_ref(output, labels, eps: float = 1e-3, max_iter: int = 100,
                       reduction: str = "mean"):
    """Pure-JAX reference (direct |x-y|^2 cost, per-batch Sinkhorn with early exit)."""
    output = jnp.asarray(output, jnp.float32)
    labels = jnp.asarray(labels, jnp.float32)
    _, N, _ = output.shape
    M = labels.shape[1]
    log_mu = math.log(1.0 / N + 1e-8)
    log_nu = math.log(1.0 / M + 1e-8)
    thresh = 0.1

    def single(x, y):                                     # x (N,D), y (M,D)
        C = jnp.sum((x[:, None, :] - y[None, :, :]) ** 2, -1)

        def Mfn(u, v):
            return (-C + u[:, None] + v[None, :]) / eps

        def cond(c):
            it, _, _, err = c
            return jnp.logical_and(it < max_iter, err >= thresh)

        def body(c):
            it, u, v, _ = c
            u1 = u
            u = eps * (log_mu - jax.nn.logsumexp(Mfn(u, v), axis=-1)) + u
            v = eps * (log_nu - jax.nn.logsumexp(Mfn(u, v).T, axis=-1)) + v
            err = jnp.sum(jnp.abs(u - u1))
            return (it + 1, u, v, err)

        init = (jnp.int32(0), jnp.zeros((N,), jnp.float32),
                jnp.zeros((M,), jnp.float32), jnp.float32(jnp.inf))
        _, u, v, _ = lax.while_loop(cond, body, init)
        pi = jnp.exp(Mfn(u, v))
        return jnp.sum(pi * C)

    costs = jax.vmap(single)(output, labels)
    return jnp.mean(costs) if reduction == "mean" else jnp.sum(costs)


if __name__ == "__main__":
    key = jax.random.PRNGKey(0)
    k1, k2 = jax.random.split(key)
    B, N, M, D = 2, 8, 8, 4
    output = jax.random.normal(k1, (B, N, D), dtype=jnp.float32)
    labels = jax.random.normal(k2, (B, M, D), dtype=jnp.float32)

    res = wass_dist_loss(output, labels)
    jax.block_until_ready(res)

    ref = wass_dist_loss_ref(output, labels)
    assert jnp.isfinite(res), "kernel produced non-finite loss"
    # kernel builds C via the norm/inner-product identity (MXU); only fp-rounding differs
    # from the direct |x-y|^2 reference, so a modest tolerance is sufficient.
    assert jnp.allclose(res, ref, rtol=5e-3, atol=1e-4), (res, ref)

    print("KERNEL_OK")
</pallas_src>

<mosaic_0001>
module attributes {stable_mosaic.version = 11 : i64} {
  func.func @kernel(%arg0: i32, %arg1: memref<1x8x4xf32, #tpu.memory_space<vmem>>, %arg2: memref<1x4x8xf32, #tpu.memory_space<vmem>>, %arg3: memref<1x8x128xf32, #tpu.memory_space<vmem>>) attributes {dimension_semantics = [#tpu.dimension_semantics<parallel>], iteration_bounds = array<i64: 2>, scalar_prefetch = 0 : i64, scratch_operands = 0 : i64, tpu.core_type = #tpu.core_type<tc>, window_params = [{transform_indices = @transform_0, window_bounds = array<i64: 1, 8, 4>}, {transform_indices = @transform_1, window_bounds = array<i64: 1, 4, 8>}, {transform_indices = @transform_2, window_bounds = array<i64: 1, 8, 128>}]} {
    %c0 = arith.constant 0 : index
    %c0_0 = arith.constant 0 : index
    %c0_1 = arith.constant 0 : index
    %0 = vector.load %arg1[%c0, %c0_0, %c0_1] : memref<1x8x4xf32, #tpu.memory_space<vmem>>, vector<1x8x4xf32>
    %1 = vector.shape_cast %0 : vector<1x8x4xf32> to vector<8x4xf32>
    %c0_2 = arith.constant 0 : index
    %c0_3 = arith.constant 0 : index
    %c0_4 = arith.constant 0 : index
    %2 = vector.load %arg2[%c0_2, %c0_3, %c0_4] : memref<1x4x8xf32, #tpu.memory_space<vmem>>, vector<1x4x8xf32>
    %3 = vector.shape_cast %2 : vector<1x4x8xf32> to vector<4x8xf32>
    %4 = arith.mulf %1, %1 : vector<8x4xf32>
    %cst = arith.constant dense<0.000000e+00> : vector<8xf32>
    %5 = vector.multi_reduction <add>, %4, %cst [1] : vector<8x4xf32> to vector<8xf32>
    %6 = vector.shape_cast %5 : vector<8xf32> to vector<8x1xf32>
    %7 = arith.mulf %3, %3 : vector<4x8xf32>
    %cst_5 = arith.constant dense<0.000000e+00> : vector<8xf32>
    %8 = vector.multi_reduction <add>, %7, %cst_5 [0] : vector<4x8xf32> to vector<8xf32>
    %9 = vector.shape_cast %8 : vector<8xf32> to vector<1x8xf32>
    %cst_6 = arith.constant dense<0.000000e+00> : vector<8x8xf32>
    %10 = tpu.matmul %1, %3, %cst_6 {dimension_numbers = #tpu.dot_dimension_numbers<[1], [0], [0], [1], [0, 0, 1, 1], [], []>} : vector<8x4xf32>, vector<4x8xf32>, vector<8x8xf32> -> vector<8x8xf32>
    %cst_7 = arith.constant 2.000000e+00 : f32
    %11 = vector.broadcast %cst_7 : f32 to vector<8x8xf32>
    %12 = arith.mulf %11, %10 : vector<8x8xf32>
    %13 = vector.broadcast %6 : vector<8x1xf32> to vector<8x8xf32>
    %14 = arith.subf %12, %13 : vector<8x8xf32>
    %15 = vector.broadcast %9 : vector<1x8xf32> to vector<8x8xf32>
    %16 = arith.subf %14, %15 : vector<8x8xf32>
    %cst_8 = arith.constant 1.000000e+03 : f32
    %17 = vector.broadcast %cst_8 : f32 to vector<8x8xf32>
    %18 = arith.mulf %16, %17 : vector<8x8xf32>
    %cst_9 = arith.constant 0.000000e+00 : f32
    %19 = vector.broadcast %cst_9 : f32 to vector<8x1xf32>
    %cst_10 = arith.constant 0.000000e+00 : f32
    %20 = vector.broadcast %cst_10 : f32 to vector<1x8xf32>
    %cst_11 = arith.constant -2.07944155 : f32
    %cst_12 = arith.constant -2.07944155 : f32
    %c0_i32 = arith.constant 0 : i32
    %cst_13 = arith.constant 0x7F800000 : f32
    %21:4 = scf.while (%arg4 = %c0_i32, %arg5 = %19, %arg6 = %20, %arg7 = %cst_13) : (i32, vector<8x1xf32>, vector<1x8xf32>, f32) -> (i32, vector<8x1xf32>, vector<1x8xf32>, f32) {
      %c100_i32 = arith.constant 100 : i32
      %35 = arith.cmpi slt, %arg4, %c100_i32 : i32
      %cst_19 = arith.constant 1.000000e-01 : f32
      %36 = arith.cmpf oge, %arg7, %cst_19 : f32
      %37 = arith.andi %35, %36 : i1
      scf.condition(%37) %arg4, %arg5, %arg6, %arg7 : i32, vector<8x1xf32>, vector<1x8xf32>, f32
    } do {
    ^bb0(%arg4: i32, %arg5: vector<8x1xf32>, %arg6: vector<1x8xf32>, %arg7: f32):
      %35 = vector.broadcast %arg5 : vector<8x1xf32> to vector<8x8xf32>
      %36 = arith.addf %18, %35 : vector<8x8xf32>
      %37 = vector.broadcast %arg6 : vector<1x8xf32> to vector<8x8xf32>
      %38 = arith.addf %36, %37 : vector<8x8xf32>
      %cst_19 = arith.constant dense<0xFF800000> : vector<8xf32>
      %39 = vector.multi_reduction <maximumf>, %38, %cst_19 [1] : vector<8x8xf32> to vector<8xf32>
      %40 = vector.shape_cast %39 : vector<8xf32> to vector<8x1xf32>
      %41 = vector.broadcast %40 : vector<8x1xf32> to vector<8x8xf32>
      %42 = arith.subf %38, %41 : vector<8x8xf32>
      %43 = math.exp %42 : vector<8x8xf32>
      %cst_20 = arith.constant dense<0.000000e+00> : vector<8xf32>
      %44 = vector.multi_reduction <add>, %43, %cst_20 [1] : vector<8x8xf32> to vector<8xf32>
      %45 = vector.shape_cast %44 : vector<8xf32> to vector<8x1xf32>
      %46 = math.log %45 : vector<8x1xf32>
      %47 = arith.addf %40, %46 : vector<8x1xf32>
      %48 = vector.broadcast %cst_11 : f32 to vector<8x1xf32>
      %49 = arith.subf %48, %47 : vector<8x1xf32>
      %50 = arith.addf %49, %arg5 : vector<8x1xf32>
      %51 = vector.broadcast %50 : vector<8x1xf32> to vector<8x8xf32>
      %52 = arith.addf %18, %51 : vector<8x8xf32>
      %53 = vector.broadcast %arg6 : vector<1x8xf32> to vector<8x8xf32>
      %54 = arith.addf %52, %53 : vector<8x8xf32>
      %cst_21 = arith.constant dense<0xFF800000> : vector<8xf32>
      %55 = vector.multi_reduction <maximumf>, %54, %cst_21 [0] : vector<8x8xf32> to vector<8xf32>
      %56 = vector.shape_cast %55 : vector<8xf32> to vector<1x8xf32>
      %57 = vector.broadcast %56 : vector<1x8xf32> to vector<8x8xf32>
      %58 = arith.subf %54, %57 : vector<8x8xf32>
      %59 = math.exp %58 : vector<8x8xf32>
      %cst_22 = arith.constant dense<0.000000e+00> : vector<8xf32>
      %60 = vector.multi_reduction <add>, %59, %cst_22 [0] : vector<8x8xf32> to vector<8xf32>
      %61 = vector.shape_cast %60 : vector<8xf32> to vector<1x8xf32>
      %62 = math.log %61 : vector<1x8xf32>
      %63 = arith.addf %56, %62 : vector<1x8xf32>
      %64 = vector.broadcast %cst_12 : f32 to vector<1x8xf32>
      %65 = arith.subf %64, %63 : vector<1x8xf32>
      %66 = arith.addf %65, %arg6 : vector<1x8xf32>
      %67 = arith.subf %50, %arg5 : vector<8x1xf32>
      %68 = math.absf %67 : vector<8x1xf32>
      %69 = vector.shape_cast %68 : vector<8x1xf32> to vector<1x8x1xf32>
      %cst_23 = arith.constant dense<0.000000e+00> : vector<1xf32>
      %70 = vector.multi_reduction <add>, %69, %cst_23 [1, 2] : vector<1x8x1xf32> to vector<1xf32>
      %71 = vector.shape_cast %70 : vector<1xf32> to vector<1x1x1xf32>
      %72 = vector.extract %71[0, 0, 0] : f32 from vector<1x1x1xf32>
      %cst_24 = arith.constant 1.000000e-03 : f32
      %73 = arith.mulf %cst_24, %72 : f32
      %c1_i32 = arith.constant 1 : i32
      %74 = arith.addi %arg4, %c1_i32 : i32
      scf.yield %74, %50, %66, %73 : i32, vector<8x1xf32>, vector<1x8xf32>, f32
    }
    %22 = vector.broadcast %21#1 : vector<8x1xf32> to vector<8x8xf32>
    %23 = arith.addf %18, %22 : vector<8x8xf32>
    %24 = vector.broadcast %21#2 : vector<1x8xf32> to vector<8x8xf32>
    %25 = arith.addf %23, %24 : vector<8x8xf32>
    %26 = math.exp %25 : vector<8x8xf32>
    %27 = arith.mulf %26, %18 : vector<8x8xf32>
    %28 = vector.shape_cast %27 : vector<8x8xf32> to vector<1x8x8xf32>
    %cst_14 = arith.constant dense<0.000000e+00> : vector<1xf32>
    %29 = vector.multi_reduction <add>, %28, %cst_14 [1, 2] : vector<1x8x8xf32> to vector<1xf32>
    %30 = vector.shape_cast %29 : vector<1xf32> to vector<1x1x1xf32>
    %31 = vector.extract %30[0, 0, 0] : f32 from vector<1x1x1xf32>
    %cst_15 = arith.constant -1.000000e-03 : f32
    %32 = arith.mulf %cst_15, %31 : f32
    %33 = vector.broadcast %32 : f32 to vector<1x8x128xf32>
    %c0_16 = arith.constant 0 : index
    %c0_17 = arith.constant 0 : index
    %c0_18 = arith.constant 0 : index
    %34 = vector.load %arg3[%c0_16, %c0_17, %c0_18] : memref<1x8x128xf32, #tpu.memory_space<vmem>>, vector<1x8x128xf32>
    tpu.vector_store %arg3[%c0_16, %c0_17, %c0_18], %33 {strides = array<i32>} : memref<1x8x128xf32, #tpu.memory_space<vmem>>, vector<1x8x128xf32>,
    return
  }
  func.func @transform_0(%arg0: i32) -> (i32, i32, i32) {
    %c0_i32 = arith.constant 0 : i32
    %c0_i32_0 = arith.constant 0 : i32
    %c0_i32_1 = arith.constant 0 : i32
    return %arg0, %c0_i32, %c0_i32_0 : i32, i32, i32
  }
  func.func @transform_1(%arg0: i32) -> (i32, i32, i32) {
    %c0_i32 = arith.constant 0 : i32
    %c0_i32_0 = arith.constant 0 : i32
    %c0_i32_1 = arith.constant 0 : i32
    return %arg0, %c0_i32, %c0_i32_0 : i32, i32, i32
  }
  func.func @transform_2(%arg0: i32) -> (i32, i32, i32) {
    %c0_i32 = arith.constant 0 : i32
    %c0_i32_0 = arith.constant 0 : i32
    %c0_i32_1 = arith.constant 0 : i32
    return %arg0, %c0_i32, %c0_i32_0 : i32, i32, i32
  }
}

</mosaic_0001>

<bundles_post_ra>
// kernel: tpu_custom_call.1
= control target key start
LH: loop header
LB: loop body
LE: loop exit
PB: predicated region body
PF: predicated region fallthrough
CT: control target
= control target key end

     0   :  { %7 = vsyncpa [#allocation3], 0  ;;  %s776_s0 = inlined_call_operand.vmem [shape: f32[2,8,4], index: 0, kind: input, shape index: {}]   ;;  %s777_s1 = inlined_call_operand.vmem [shape: f32[2,4,8], index: 1, kind: input, shape index: {}]   ;;  %s778_s2 = inlined_call_operand.hbm [shape: f32[2,8,128], index: 2, kind: output, shape index: {}]  }
   0x1   :  { %9 = vsyncpa [#allocation3 + $0x1], 0  ;;  %s641_s9 = smov 0   ;;  %s643_s10 = smov 0  }
   0x2   :  { %s645_s11 = smov 0   ;;  %s647_s12 = smov 0  }
   0x3 LB: > { %s662_s13 = sadd.s32 4294967295, %s609_s12   ;;  %s438_s14 = sadd.s32 4294967294, %s609_s12   ;;  %s609_s12 = sphi %s647_s12, %s786_s12   ;;  %s605_s11 = sphi %s645_s11, %s785_s11   ;;  %s601_s10 = sphi %s643_s10, %s784_s10   ;;  %s597_s9 = sphi %s641_s9, %s783_s9  }
   0x4   : > { %s666_s15 = sadd.s32 1, %s609_s12   ;;  %s74_s16 = sadd.s32 1, %s605_s11 }
   0x5   : > { %s71_s17 = ssub.s32 %s609_s12, %s666_s15  ;;  %p84_p0 = scmp.ne.s32.totalorder %s605_s11, %s601_s10 }
   0x6   : > { %p72_p1 = scmp.eq.s32.totalorder %s71_s17, 0  ;;  %p85_p2 = scmp.eq.s32.totalorder %s662_s13, 1 }
   0x7   : > { %p90_p3 = scmp.ne.s32.totalorder %s601_s10, %s597_s9  ;;  %p91_p4 = scmp.eq.s32.totalorder %s438_s14, 1 }
   0x8   : > { %s677_s18 = scalar_select %p72_p1, %s605_s11, %s74_s16  }
   0x9   : > { %p679_p5 = por %p85_p2, %p84_p0  ;;  %p683_p6 = por %p91_p4, %p90_p3 }
   0xa   : > { %p441_p7 = scmp.ge.s32.totalorder %s609_s12, 1  ;;  %p123_p8 = scmp.lt.s32.totalorder %s609_s12, 3 }
   0xc   : > { %p124_p9 = pnand %p441_p7, %p123_p8 }
   0xd   : > { %p148_p10 = scmp.lt.s32.totalorder (!%p124_p9), %s662_s13, 1  ;;  %s145_s21 = sand.u32 (!%p124_p9), 1, %s601_s10  }
   0xe   : > { %127 = sbr.rel (%p124_p9) target bundleno = 995 (0x3e3), region = 28  ;;  %s693_s22 = sshll.u32 (!%p124_p9), %s145_s21, 3 }
   0xf   : > { %s147_s4 = scalar_lea.vmem (!%p124_p9), [#allocation2], %s693_s22  ;;  %s709_s5 = smov (!%p124_p9), 0  }
  0x13   : > { %v623_v0 = vmov 0.0   ;;  %vm624_vm0 = vmmov 0   ;;  %s149_s23 = scalar_select %p148_p10, %s662_s13, 1  ;;  %vm175_vm1 = vcmask 1043456   ;;  %vm159_vm2 = vcmask 31744  }
  0x14   : > { %453 = vmatprep.subr.mxu0 %v623_v0  ;;  %455 = vmatprep.mubr.msk.f32.mxu0 %vm624_vm0, %v623_v0  ;;  %vm164_vm3 = vcmask 60416   ;;  %v705_v20 = vmov 0.0   ;;  %v707_v21 = vmov 0.0  }
  0x15   : > { %s444_s24 = sshll.u32 %s149_s23, 2  ;;  %s443_s25 = sshll.u32 %s149_s23, 3 }
  0x16   : > { %s155_s28 = scalar_lea.vmem %s777_s1, %s444_s24  ;;  %s151_s3 = scalar_lea.vmem %s776_s0, %s443_s25 }
  0x17   : > { %v157_v1 = vld [vmem:[%s155_s28] sm:$0xf] }
  0x18   : > { %v156_v2 = vld [vmem:[%s151_s3] sm:$0xff]  ;;  %454 = vmatpush3.msk.msra.mxu0 %vm175_vm1, %v157_v1  ;;  %v163_v5 = vmul.f32 %v157_v1, %v157_v1 }
  0x19   : > { %v158_v3 = vmul.f32 %v156_v2, %v156_v2  ;;  %456 = vmatmul.mubr.msk.f32.vlgmr.msra.gmra.mxu0 %vm159_vm2, %v156_v2 }
  0x1a   : > { %v165_v6 = vsel %vm164_vm3, %v163_v5, 0.0 }
  0x1b   : > { %v160_v4 = vsel %vm159_vm2, %v158_v3, 0.0  ;;  %v166_v7 = vrot.slane %v165_v6, 4 }
  0x1c   : > { %161 = vadd.xlane.f32.xlu0 %v160_v4 }
  0x1d   : > { %v167_v8 = vadd.f32 %v166_v7, %v165_v6 }
  0x1f   : > { %v168_v9 = vrot.slane %v167_v8, 2 }
  0x21   : > { %v169_v10 = vadd.f32 %v168_v9, %v167_v8 }
  0x23   : > { %v170_v11 = vrot.slane %v169_v10, 1 }
  0x25   : > { %v171_v15 = vadd.f32 %v170_v11, %v169_v10 }
  0xa5   : > { %v162_v13 = vpop.xlane.xlu0 %161 }
  0xd9   : > { %v245_v12 = vpop.f32.mrf.mxu0 }
  0xda   : > { %v249_v14 = vmul.f32 2.0, %v245_v12 }
  0xdb   : > { %v457_v16 = vpop.f32.mrf.mxu0 }
  0xdc   : > { %v250_v17 = vsub.f32 %v249_v14, %v162_v13 }
  0xde   : > { %v251_v18 = vsub.f32 %v250_v17, %v171_v15 }
  0xe0   : > { %v702_v19 = vmul.f32 1000.0, %v251_v18 }
  0xe1 LB: >> { %vm266_vm4 = vcmask 64512   ;;  %vm307_vm5 = vcmask 7168   ;;  %s319_s5 = sadd.s32 1, %s621_s5   ;;  %s621_s5 = sphi %s709_s5, %s319_s5   ;;  %v617_v21 = vphi %v707_v21, %v782_v21   ;;  %v613_v20 = vphi %v705_v20, %v781_v20  }
  0xe2   : >> { %v264_v22 = vadd.f32 %v617_v21, %v702_v19  ;;  %p258_p11 = scmp.lt.s32.totalorder %s319_s5, 100 }
  0xe4   : >> { %v265_v23 = vadd.f32 %v613_v20, %v264_v22 }
  0xe6   : >> { %v267_v24 = vsel %vm266_vm4, %v265_v23, -inf }
  0xe7   : >> { %268 = vmax.xlane.f32.xlu0 %v267_v24 }
 0x170   : >> { %v269_v25 = vpop.xlane.xlu0 %268 }
 0x171   : >> { %v270_v26 = vsub.f32 %v265_v23, %v269_v25 }
 0x173   : >> { %v271_v27 = vmul.f32 1.442695, %v270_v26 }
 0x175   : >> { %527 = vpow2.f32 %v271_v27 }
 0x182   : >> { %v528_v28 = vpop.eup %527 }
 0x183   : >> { %v273_v29 = vsel %vm266_vm4, %v528_v28, 0.0 }
 0x184   : >> { %274 = vadd.xlane.f32.xlu0 %v273_v29 }
 0x20d   : >> { %v275_v30 = vpop.xlane.xlu0 %274 }
 0x20e   : >> { %529 = vlog2.f32 %v275_v30 }
 0x21b   : >> { %v530_v31 = vpop.eup %529 }
 0x21c   : >> { %v277_v32 = vmul.f32 0.6931472, %v530_v31 }
 0x21e   : >> { %v278_v33 = vadd.f32 %v277_v32, %v269_v25 }
 0x220   : >> { %v279_v34 = vsub.f32 -2.0794415, %v278_v33 }
 0x222   : >> { %v280_v35 = vadd.f32 %v617_v21, %v279_v34  }
 0x224   : >> { %v305_v36 = vsub.f32 %v280_v35, %v617_v21  ;;  %v281_v37 = vadd.f32 %v280_v35, %v702_v19  ;;  %v782_v21 = vmov %v280_v35 }
 0x226   : >> { %v306_v38 = vand.u32 2147483647, %v305_v36  ;;  %v282_v39 = vadd.f32 %v613_v20, %v281_v37 }
 0x228   : >> { %v308_v40 = vsel %vm307_vm5, %v306_v38, 0.0  ;;  %v283_v41 = vsel %vm266_vm4, %v282_v39, -inf }
 0x229   : >> { %309 = vadd.xlane.f32.xlu1 %v308_v40  ;;  %v284_v42 = vrot.slane %v283_v41, 4 }
 0x22b   : >> { %v285_v43 = vmax.f32 %v283_v41, %v284_v42 }
 0x22d   : >> { %v286_v44 = vrot.slane %v285_v43, 2 }
 0x22f   : >> { %v287_v45 = vmax.f32 %v285_v43, %v286_v44 }
 0x231   : >> { %v288_v46 = vrot.slane %v287_v45, 1 }
 0x233   : >> { %v289_v47 = vmax.f32 %v287_v45, %v288_v46 }
 0x235   : >> { %v290_v48 = vsub.f32 %v282_v39, %v289_v47 }
 0x237   : >> { %v291_v49 = vmul.f32 1.442695, %v290_v48 }
 0x239   : >> { %531 = vpow2.f32 %v291_v49 }
 0x246   : >> { %v532_v50 = vpop.eup %531 }
 0x247   : >> { %v293_v51 = vsel %vm266_vm4, %v532_v50, 0.0 }
 0x248   : >> { %v294_v52 = vrot.slane %v293_v51, 4 }
 0x24a   : >> { %v295_v53 = vadd.f32 %v294_v52, %v293_v51 }
 0x24c   : >> { %v296_v54 = vrot.slane %v295_v53, 2 }
 0x24e   : >> { %v297_v55 = vadd.f32 %v296_v54, %v295_v53 }
 0x250   : >> { %v298_v56 = vrot.slane %v297_v55, 1 }
 0x252   : >> { %v299_v57 = vadd.f32 %v298_v56, %v297_v55 }
 0x254   : >> { %533 = vlog2.f32 %v299_v57 }
 0x261   : >> { %v534_v58 = vpop.eup %533 }
 0x262   : >> { %v301_v59 = vmul.f32 0.6931472, %v534_v58 }
 0x264   : >> { %v302_v60 = vadd.f32 %v301_v59, %v289_v47 }
 0x266   : >> { %v303_v61 = vsub.f32 -2.0794415, %v302_v60 }
 0x268   : >> { %v304_v62 = vadd.f32 %v613_v20, %v303_v61  }
 0x26a   : >> { %v781_v20 = vmov %v304_v62 }
 0x2b2   : >> { %v310_v63 = vpop.xlane.xlu1 %309 }
 0x2b3   : >> { %v311_v0 = vrot.slane %v310_v63, 4 }
 0x2b5   : >> { %v312_v1 = vadd.f32 %v311_v0, %v310_v63 }
 0x2b7   : >> { %v313_v2 = vrot.slane %v312_v1, 2 }
 0x2b9   : >> { %v314_v3 = vadd.f32 %v313_v2, %v312_v1 }
 0x2bb   : >> { %v315_v4 = vrot.slane %v314_v3, 1 }
 0x2bd   : >> { %v316_v5 = vadd.f32 %v315_v4, %v314_v3 }
 0x2bf   : >> { %458 = vpush %v316_v5 }
 0x2f0   : >> { %s459_s6 = spop %458 }
 0x2f1   : >> { %s318_s7 = smul.f32 0.001, %s459_s6 }
 0x2f3   : >> { %p259_p12 = scmp.ge.f32.partialorder %s318_s7, 0.1 }
 0x2f5   : >> { %p260_p13 = pnand %p259_p12, %p258_p11 }
 0x2f6   : > { %v321_v6 = vadd.f32 (%p260_p13), %v304_v62, %v281_v37  ;;  %s448_s8 = sshll.u32 (%p260_p13), %s662_s13, 7  ;;  %s353_s14 = sshll.u32 (%p260_p13), %s147_s4, 4  ;;  %s354_s14 = int_to_ptr.vmem [resolvable:$true] %s353_s14 }
 0x2f7   : > { %263 = sbr.rel (!%p260_p13) target bundleno = 225 (0xe1), region = 73  ;;  %s737_s25 = scalar_lea.hbm (%p260_p13), %s778_s2, %s448_s8 }
 0x2f8   : > { %v322_v7 = vmul.f32 (%p260_p13), 1.442695, %v321_v6  ;;  %s340_s26 = scalar_lea.sflag (%p260_p13), [#allocation3], %s145_s21  ;;  %s537_s27 = scalar_lea.vmem (%p260_p13), %s354_s14, 128 }
 0x2f9   : > { %p538_p0 = scmp.ne.s32.totalorder (%p260_p13), %s354_s14, %s537_s27  ;;  %s625_s13 = smov (%p260_p13), [#allocation2]  }
 0x2fa   : > { %535 = vpow2.f32 (%p260_p13), %v322_v7  ;;  %s541_s28 = sshll.u32 (%p260_p13), %s625_s13, 4  ;;  %s542_s28 = int_to_ptr.vmem [resolvable:$false] %s541_s28 }
 0x2fb   : > { %p539_p1 = pnand (%p260_p13), %p538_p0, %p679_p5  ;;  %s543_s29 = scalar_lea.vmem (%p260_p13), %s542_s28, 256 }
 0x2fc   : > { %p544_p3 = scmp.lt.s32.totalorder %s354_s14, %s542_s28  ;;  %p545_p4 = scmp.lt.s32.totalorder %s543_s29, %s537_s27 }
 0x2fd   : > { %p540_p2 = pneg %p539_p1 }
 0x2fe   : > { %p546_p7 = por %p545_p4, %p544_p3 }
 0x300   : > { %p547_p8 = pnand %p546_p7, %p540_p2 }
 0x307   : > { %v536_v8 = vpop.eup %535 }
 0x308   : > { %v324_v9 = vmul.f32 %v536_v8, %v702_v19 }
 0x30a   : > { %v326_v10 = vsel %vm266_vm4, %v324_v9, 0.0 }
 0x30b   : > { %327 = vadd.xlane.f32.xlu0 %v326_v10 }
 0x394   : > { %v328_v11 = vpop.xlane.xlu0 %327 }
 0x395   : > { %v329_v12 = vrot.slane %v328_v11, 4 }
 0x397   : > { %v330_v13 = vadd.f32 %v329_v12, %v328_v11 }
 0x399   : > { %v331_v14 = vrot.slane %v330_v13, 2 }
 0x39b   : > { %v332_v15 = vadd.f32 %v331_v14, %v330_v13 }
 0x39d   : > { %v333_v16 = vrot.slane %v332_v15, 1 }
 0x39f   : > { %v334_v17 = vadd.f32 %v333_v16, %v332_v15 }
 0x3a1   : > { %460 = vpush %v334_v17 }
 0x3d2   : > { %s461_s16 = spop %460 }
 0x3d3   : > { %s336_s17 = smul.f32 -0.001, %s461_s16 }
 0x3d5   : > { %v337_v18 = vstv %s336_s17 }
 0x3d6   : > { %338 = vst [vmem:[%s147_s4] sm:$0xff] %v337_v18 }
 0x3d7   : > { %550 = shalt.err (!%p547_p8)
}
 0x3d8   : > { %s551_s22 = scalar_lea.hbm %s737_s25, 128  ;;  %s555_s3 = scalar_lea.hbm %s778_s2, 256 }
 0x3d9   : > { %p552_p9 = scmp.ne.s32.totalorder %s737_s25, %s551_s22  ;;  %p556_p12 = scmp.lt.s32.totalorder %s737_s25, %s778_s2 }
 0x3da   : > { %p557_p13 = scmp.lt.s32.totalorder %s555_s3, %s551_s22 }
 0x3db   : > { %p553_p10 = pnand %p552_p9, %p679_p5 }
 0x3dc   : > { %p558_p0 = por %p557_p13, %p556_p12 }
 0x3dd   : > { %p554_p11 = pneg %p553_p10 }
 0x3df   : > { %p559_p1 = pnand %p558_p0, %p554_p11 }
 0x3e1   : > { %562 = shalt.err (!%p559_p1)
}
 0x3e2   : > { %462 = dma.vmem_to_hbm [thread:$0]  (%p679_p5), %s354_s14, 128, %s737_s25, %s340_s26  }
 0x3e3 PF: > { %p468_p2 = scmp.ge.s32.totalorder %s609_s12, 2  ;;  %s365_s6 = sand.u32 1, %s597_s9  }
 0x3e4   : > { %s366_s7 = scalar_lea.sflag [#allocation3], %s365_s6 }
 0x3e5   : > { %p465_p3 = pnand %p468_p2, %p683_p6 }
 0x3e7   : > { %p466_p4 = pneg %p465_p3 }
 0x3e9   : > { %592 = dma.done.wait (%p466_p4), %s366_s7, 128  }
 0x3ea   : > { %594 = vsyncadd (%p466_p4), %s366_s7, 4294967168  ;;  %p12_p7 = scmp.ge.s32.totalorder %s666_s15, 4   ;;  %s783_s9 = smov %s601_s10 }
 0x3eb   : > { %s784_s10 = smov %s605_s11  ;;  %s785_s11 = smov %s677_s18 }
 0x3ec   : > { %s786_s12 = smov %s666_s15  ;;  %14 = sbr.rel (!%p12_p7) target bundleno = 3 (0x3), region = 84 }
 0x3f1   :  { %371 = vsyncpa [#allocation3], 1 }
 0x3f2   :  { %373 = vsyncpa [#allocation3 + $0x1], 1 }

</bundles_post_ra>
